<compile_context>
chip_gen: v5e
topology: v5e:2x2
jax: 0.10.0
libtpu: 0.0.40
codegen_flags: <defaults>
</compile_context>

<pallas_src>
import numpy as np
import jax
import jax.numpy as jnp
from jax.experimental import pallas as pl
from jax.experimental.pallas import tpu as pltpu

# ----------------------- synthetic "detection head" configuration -----------------------
NA = 3                     # anchors per layer
NC = 4                     # number of classes
NL = 3                     # number of feature layers
NO = NC + 5
IGNORE_THRESH = 0.7
COORD_SCALE = 1.0
NOOBJ_SCALE = 1.0
OBJ_SCALE = 5.0
CLASS_SCALE = 1.0

# anchors expressed in grid units of each feature map (deterministic, synthetic)
ANCHORS = [
    np.array([[1.0, 1.5], [2.0, 2.0], [3.0, 2.5]], dtype=np.float32),   # layer 0 (8x8)
    np.array([[0.8, 1.0], [1.2, 1.6], [2.0, 2.4]], dtype=np.float32),   # layer 1 (4x4)
    np.array([[0.5, 0.6], [0.9, 1.0], [1.4, 1.6]], dtype=np.float32),   # layer 2 (2x2)
]
ANCHOR_MASKS = np.arange(NL * NA).reshape(NL, NA)

# ----------------------------- packed channel-major layout ------------------------------
# packed[c] is a lane-dense (N_pad/128, 128) plane for channel c.
CH_X, CH_Y, CH_W, CH_H, CH_CONF = 0, 1, 2, 3, 4
CH_PROB = 5                      # 5 .. 5+NC-1       class logits
CH_BT = NO                       # NO .. NO+3        box target (tx, ty, tw, th)
CH_BM = NO + 4                   # box mask
CH_BSC = NO + 5                  # box scale
CH_IT = NO + 6                   # iou target
CH_IM = NO + 7                   # iou mask (0 ignore, 1 noobj, 2 obj; pads are 0)
CH_CT = NO + 8                   # NO+8 .. NO+8+NC-1 class target
CH_CM = NO + 8 + NC              # class mask
C_TOTAL = NO + 9 + NC            # = 22 channels


# ------------------------------- host-side target building ------------------------------
def _sigmoid_np(x):
    return 1.0 / (1.0 + np.exp(-x))


def _bboxes_iou_np(a, b, xyxy=True):
    if xyxy:
        tl = np.maximum(a[:, None, :2], b[None, :, :2])
        br = np.minimum(a[:, None, 2:], b[None, :, 2:])
        area_a = np.prod(a[:, 2:] - a[:, :2], axis=1)
        area_b = np.prod(b[:, 2:] - b[:, :2], axis=1)
    else:
        tl = np.maximum(a[:, None, :2] - a[:, None, 2:] / 2, b[None, :, :2] - b[None, :, 2:] / 2)
        br = np.minimum(a[:, None, :2] + a[:, None, 2:] / 2, b[None, :, :2] + b[None, :, 2:] / 2)
        area_a = np.prod(a[:, 2:], axis=1)
        area_b = np.prod(b[:, 2:], axis=1)
    en = (tl < br).astype(np.float32).prod(axis=2)
    area_i = np.prod(br - tl, axis=2) * en
    return area_i / (area_a[:, None] + area_b[None, :] - area_i)


def _build_targets_np(p_np, targets_np, ref_anchors, i):
    """Host NumPy reproduction of YOLOv3Loss.build_targets (data-dependent, detached)."""
    bs, na, ny, nx, _ = p_np.shape
    S = ny * nx
    x_shift = np.broadcast_to(np.arange(nx, dtype=np.float32), (bs, na, ny, nx))
    y_shift = np.broadcast_to(np.arange(ny, dtype=np.float32).reshape(ny, 1), (bs, na, ny, nx))
    w_anch = np.broadcast_to(ANCHORS[i][:, 0].reshape(1, na, 1, 1), (bs, na, ny, nx))
    h_anch = np.broadcast_to(ANCHORS[i][:, 1].reshape(1, na, 1, 1), (bs, na, ny, nx))
    xy = _sigmoid_np(p_np[..., :2]).copy()
    xy[..., 0] += x_shift
    xy[..., 1] += y_shift
    wh = np.exp(p_np[..., 2:4])
    wh[..., 0] *= w_anch
    wh[..., 1] *= h_anch
    pred_boxes = np.concatenate((xy, wh), axis=4).reshape(bs, na, -1, 4)

    box_target = np.zeros((bs, na, S, 4), np.float32)
    box_mask = np.zeros((bs, na, S, 1), np.float32)
    box_scale = np.zeros((bs, na, S, 1), np.float32)
    iou_target = np.zeros((bs, na, S, 1), np.float32)
    iou_mask = np.ones((bs, na, S, 1), np.float32)
    class_target = np.zeros((bs, na, S, NC), np.float32)
    class_mask = np.zeros((bs, na, S, 1), np.float32)

    for bi in range(bs):
        sel = targets_np[:, 0] == bi
        num_obj = int(sel.sum())
        if num_obj == 0:
            continue
        gt_targets = targets_np[sel]
        gt_boxes = gt_targets[:, 2:6].copy()
        truth_boxes = gt_boxes.copy()
        truth_boxes[:, :2] = 0.0
        gt_boxes[:, 0::2] *= nx
        gt_boxes[:, 1::2] *= ny
        gt_cls_ids = gt_targets[:, 1].astype(np.int64)

        ious = _bboxes_iou_np(pred_boxes[bi].reshape(-1, 4), gt_boxes, xyxy=False)
        ious = ious.reshape(na, -1, num_obj)
        max_iou = ious.max(axis=-1, keepdims=True)                    # [na, S, 1]
        if (max_iou.reshape(-1) > IGNORE_THRESH).sum() > 0:
            iou_mask[bi][max_iou > IGNORE_THRESH] = 0.0

        truth_anchor_ious = _bboxes_iou_np(truth_boxes, ref_anchors, xyxy=True)
        best_n_all = truth_anchor_ious.argmax(axis=-1)
        best_n_mask = ((best_n_all == ANCHOR_MASKS[i][0])
                       | (best_n_all == ANCHOR_MASKS[i][1])
                       | (best_n_all == ANCHOR_MASKS[i][2]))
        if best_n_mask.sum() <= 0:
            continue
        for ni in range(num_obj):
            if best_n_mask[ni]:
                gt_box = gt_boxes[ni]
                gt_class = int(gt_cls_ids[ni])
                cell_idx_x = int(np.floor(gt_box[0]))
                cell_idx_y = int(np.floor(gt_box[1]))
                cell_idx = cell_idx_y * nx + cell_idx_x
                a_idx = int(best_n_all[ni] % na)
                box_target[bi, a_idx, cell_idx, 0] = gt_box[0] - np.float32(np.int16(gt_box[0]))
                box_target[bi, a_idx, cell_idx, 1] = gt_box[1] - np.float32(np.int16(gt_box[1]))
                box_target[bi, a_idx, cell_idx, 2] = gt_box[2] / ANCHORS[i][a_idx, 0]
                box_target[bi, a_idx, cell_idx, 3] = gt_box[3] / ANCHORS[i][a_idx, 1]
                box_mask[bi, a_idx, cell_idx, :] = 1.0
                pred_box = pred_boxes[bi, a_idx, cell_idx]
                scale = 2.0 - pred_box[2] / nx * (pred_box[3] / ny)
                if scale < 1.0 or scale > 2.0:
                    box_scale[bi, a_idx, cell_idx, :] = 0.0
                else:
                    box_scale[bi, a_idx, cell_idx, :] = scale
                iou_target[bi, a_idx, cell_idx, :] = ious[a_idx, cell_idx, ni]
                iou_mask[bi, a_idx, cell_idx, :] = 2.0
                class_target[bi, a_idx, cell_idx, gt_class] = 1.0
                class_mask[bi, a_idx, cell_idx, :] = 1.0

    return box_target, box_mask, box_scale, iou_target, iou_mask, class_target, class_mask


def _pack_inputs(p_np_list, targets_np):
    """Build targets for all layers and pack predictions + targets channel-major, lane-dense."""
    # ref anchors (normalized by each layer's grid size), mirrors the lazy init in forward()
    ref_anchors = np.zeros((NL * NA, 4), np.float32)
    for i in range(NL):
        _, _, ny, nx, _ = p_np_list[i].shape
        ref_anchors[i * NA:(i + 1) * NA, 2] = ANCHORS[i][:, 0] / nx
        ref_anchors[i * NA:(i + 1) * NA, 3] = ANCHORS[i][:, 1] / ny

    bs = p_np_list[0].shape[0]
    chunks = []
    for i, p_np in enumerate(p_np_list):
        b, na, ny, nx, no = p_np.shape
        bt, bm, bsc, it, im, ct, cm = _build_targets_np(p_np, targets_np, ref_anchors, i)
        n = b * na * ny * nx
        chunk = np.concatenate(
            [p_np.reshape(n, no),
             bt.reshape(n, 4), bm.reshape(n, 1), bsc.reshape(n, 1),
             it.reshape(n, 1), im.reshape(n, 1),
             ct.reshape(n, NC), cm.reshape(n, 1)],
            axis=1).astype(np.float32)
        chunks.append(chunk)

    rows = np.concatenate(chunks, axis=0)                       # [N, C_TOTAL]
    n_total = rows.shape[0]
    n_pad = max(1024, ((n_total + 1023) // 1024) * 1024)        # lane- and sublane-aligned
    buf = np.zeros((n_pad, C_TOTAL), np.float32)                # pad rows: all masks = 0
    buf[:n_total] = rows
    packed = np.ascontiguousarray(buf.T).reshape(C_TOTAL, n_pad // 128, 128)
    return packed, bs


# ------------------------------------ Pallas kernel -------------------------------------
def _sum_all(x):
    # two-stage reduction keeping rank-2 shapes -> (1, 1)
    return jnp.sum(jnp.sum(x, axis=1, keepdims=True), axis=0, keepdims=True)


def _sigmoid(x):
    # 1/(1+exp(-x)) is IEEE-safe here: exp(-x)->inf gives 0, exp(-x)->0 gives 1
    return 1.0 / (1.0 + jnp.exp(-x))


def _bce_with_logits(x, t):
    # numerically stable: max(x,0) - x*t + log(1 + exp(-|x|))
    return jnp.maximum(x, 0.0) - x * t + jnp.log(1.0 + jnp.exp(-jnp.abs(x)))


def _yolov3_loss_kernel(packed_ref, out_ref):
    # packed_ref: [C_TOTAL, R, 128]; every channel slice is a fully lane-dense plane.
    sig_x = _sigmoid(packed_ref[CH_X])
    sig_y = _sigmoid(packed_ref[CH_Y])
    exp_w = jnp.exp(packed_ref[CH_W])
    exp_h = jnp.exp(packed_ref[CH_H])
    conf = packed_ref[CH_CONF]

    bm = packed_ref[CH_BM]
    bsc = packed_ref[CH_BSC]
    it = packed_ref[CH_IT]
    im = packed_ref[CH_IM]
    cm = packed_ref[CH_CM]

    # ---- box (coord) loss: masked MSE; mask applied inside the diff (NaN-safe vs exp->inf)
    pos = bm > 0.0
    dx = jnp.where(pos, sig_x - packed_ref[CH_BT + 0], 0.0)
    dy = jnp.where(pos, sig_y - packed_ref[CH_BT + 1], 0.0)
    dw = jnp.where(pos, exp_w - packed_ref[CH_BT + 2], 0.0)
    dh = jnp.where(pos, exp_h - packed_ref[CH_BT + 3], 0.0)
    box_s = _sum_all(dx * dx + dy * dy + bsc * (dw * dw + dh * dh))

    # ---- objectness loss: BCE-with-logits split by iou_mask == 2 (obj) / == 1 (noobj).
    # Exact float equality is safe: the host writes exactly 0.0 / 1.0 / 2.0 in f32.
    conf_bce = _bce_with_logits(conf, it)
    obj_s = _sum_all(jnp.where(im == 2.0, conf_bce, 0.0))
    noobj_s = _sum_all(jnp.where(im == 1.0, conf_bce, 0.0))

    # ---- classification loss: masked BCE-with-logits over all NC class channels
    cls_terms = jnp.zeros_like(cm)
    for c in range(NC):  # static, tiny unroll
        cls_terms = cls_terms + _bce_with_logits(packed_ref[CH_PROB + c], packed_ref[CH_CT + c])
    cls_s = _sum_all(jnp.where(cm > 0.0, cls_terms, 0.0))

    # single (4,128) output tile: row r carries sum r broadcast across lanes
    out_ref[0:1, :] = jnp.broadcast_to(box_s, (1, 128))
    out_ref[1:2, :] = jnp.broadcast_to(obj_s, (1, 128))
    out_ref[2:3, :] = jnp.broadcast_to(noobj_s, (1, 128))
    out_ref[3:4, :] = jnp.broadcast_to(cls_s, (1, 128))


def _pallas_fused_loss(packed):
    vmem = pl.BlockSpec(memory_space=pltpu.MemorySpace.VMEM)
    return pl.pallas_call(
        _yolov3_loss_kernel,
        out_shape=jax.ShapeDtypeStruct((4, 128), jnp.float32),
        in_specs=[vmem],
        out_specs=vmem,
    )(packed)


@jax.jit
def _device_loss(packed, inv_bs):
    out = _pallas_fused_loss(packed)
    box_s, obj_s, noobj_s, cls_s = out[0, 0], out[1, 0], out[2, 0], out[3, 0]
    lbox = box_s * COORD_SCALE * inv_bs
    lobj = (obj_s * OBJ_SCALE + noobj_s * NOOBJ_SCALE) * inv_bs
    lcls = cls_s * CLASS_SCALE * inv_bs
    total = jnp.reshape(lbox + lobj + lcls, (1,))
    components = jnp.stack([lbox, lobj, lcls])
    return total, components


# ------------------------------------ loss wrapper ---------------------------------------
def yolov3_loss(p_list, targets):
    assert len(p_list) == NL
    # one batched D2H transfer (p must visit the host for the data-dependent target building)
    p_np_list, targets_np = jax.device_get((list(p_list), targets))
    p_np_list = [np.asarray(x, np.float32) for x in p_np_list]
    targets_np = np.asarray(targets_np, np.float32)

    packed_np, bs = _pack_inputs(p_np_list, targets_np)
    packed = jax.device_put(packed_np)                       # one H2D transfer, one kernel input
    return _device_loss(packed, jnp.float32(1.0 / bs))


# --------------------------------------- driver ------------------------------------------
if __name__ == "__main__":
    key = jax.random.PRNGKey(0)
    bs = 2
    feat_sizes = [(8, 8), (4, 4), (2, 2)]
    p_list = []
    for (ny, nx) in feat_sizes:
        key, sub = jax.random.split(key)
        p_list.append(0.5 * jax.random.normal(sub, (bs, NA, ny, nx, NO), dtype=jnp.float32))

    # targets: [image_id, class_id, xc, yc, w, h] (normalized coords)
    targets = jnp.array([
        [0.0, 1.0, 0.50, 0.50, 0.30, 0.40],
        [0.0, 2.0, 0.25, 0.75, 0.10, 0.15],
        [1.0, 0.0, 0.60, 0.30, 0.50, 0.60],
        [1.0, 3.0, 0.80, 0.20, 0.12, 0.20],
        [1.0, 1.0, 0.30, 0.60, 0.70, 0.80],
    ], dtype=jnp.float32)

    total, components = yolov3_loss(p_list, targets)
    total = jax.block_until_ready(total)
    components = jax.block_until_ready(components)
    assert np.all(np.isfinite(np.asarray(total))) and np.all(np.isfinite(np.asarray(components)))
    print("KERNEL_OK")
</pallas_src>

<mosaic_0001>
module attributes {stable_mosaic.version = 11 : i64} {
  func.func @_yolov3_loss_kernel(%arg0: memref<22x8x128xf32, #tpu.memory_space<vmem>>, %arg1: memref<4x128xf32, #tpu.memory_space<vmem>>) attributes {dimension_semantics = [], scalar_prefetch = 0 : i64, scratch_operands = 0 : i64, tpu.core_type = #tpu.core_type<tc>} {
    %c0 = arith.constant 0 : index
    %c0_0 = arith.constant 0 : index
    %c0_1 = arith.constant 0 : index
    %0 = vector.load %arg0[%c0, %c0_0, %c0_1] : memref<22x8x128xf32, #tpu.memory_space<vmem>>, vector<1x8x128xf32>
    %1 = vector.shape_cast %0 : vector<1x8x128xf32> to vector<8x128xf32>
    %cst = arith.constant 0.000000e+00 : f32
    %2 = vector.broadcast %cst : f32 to vector<8x128xf32>
    %3 = arith.subf %2, %1 : vector<8x128xf32>
    %4 = math.exp %3 : vector<8x128xf32>
    %cst_2 = arith.constant 1.000000e+00 : f32
    %5 = vector.broadcast %cst_2 : f32 to vector<8x128xf32>
    %6 = arith.addf %5, %4 : vector<8x128xf32>
    %cst_3 = arith.constant 1.000000e+00 : f32
    %7 = vector.broadcast %cst_3 : f32 to vector<8x128xf32>
    %8 = arith.divf %7, %6 : vector<8x128xf32>
    %c1 = arith.constant 1 : index
    %c0_4 = arith.constant 0 : index
    %c0_5 = arith.constant 0 : index
    %9 = vector.load %arg0[%c1, %c0_4, %c0_5] : memref<22x8x128xf32, #tpu.memory_space<vmem>>, vector<1x8x128xf32>
    %10 = vector.shape_cast %9 : vector<1x8x128xf32> to vector<8x128xf32>
    %cst_6 = arith.constant 0.000000e+00 : f32
    %11 = vector.broadcast %cst_6 : f32 to vector<8x128xf32>
    %12 = arith.subf %11, %10 : vector<8x128xf32>
    %13 = math.exp %12 : vector<8x128xf32>
    %cst_7 = arith.constant 1.000000e+00 : f32
    %14 = vector.broadcast %cst_7 : f32 to vector<8x128xf32>
    %15 = arith.addf %14, %13 : vector<8x128xf32>
    %cst_8 = arith.constant 1.000000e+00 : f32
    %16 = vector.broadcast %cst_8 : f32 to vector<8x128xf32>
    %17 = arith.divf %16, %15 : vector<8x128xf32>
    %c2 = arith.constant 2 : index
    %c0_9 = arith.constant 0 : index
    %c0_10 = arith.constant 0 : index
    %18 = vector.load %arg0[%c2, %c0_9, %c0_10] : memref<22x8x128xf32, #tpu.memory_space<vmem>>, vector<1x8x128xf32>
    %19 = vector.shape_cast %18 : vector<1x8x128xf32> to vector<8x128xf32>
    %20 = math.exp %19 : vector<8x128xf32>
    %c3 = arith.constant 3 : index
    %c0_11 = arith.constant 0 : index
    %c0_12 = arith.constant 0 : index
    %21 = vector.load %arg0[%c3, %c0_11, %c0_12] : memref<22x8x128xf32, #tpu.memory_space<vmem>>, vector<1x8x128xf32>
    %22 = vector.shape_cast %21 : vector<1x8x128xf32> to vector<8x128xf32>
    %23 = math.exp %22 : vector<8x128xf32>
    %c4 = arith.constant 4 : index
    %c0_13 = arith.constant 0 : index
    %c0_14 = arith.constant 0 : index
    %24 = vector.load %arg0[%c4, %c0_13, %c0_14] : memref<22x8x128xf32, #tpu.memory_space<vmem>>, vector<1x8x128xf32>
    %25 = vector.shape_cast %24 : vector<1x8x128xf32> to vector<8x128xf32>
    %c13 = arith.constant 13 : index
    %c0_15 = arith.constant 0 : index
    %c0_16 = arith.constant 0 : index
    %26 = vector.load %arg0[%c13, %c0_15, %c0_16] : memref<22x8x128xf32, #tpu.memory_space<vmem>>, vector<1x8x128xf32>
    %27 = vector.shape_cast %26 : vector<1x8x128xf32> to vector<8x128xf32>
    %c14 = arith.constant 14 : index
    %c0_17 = arith.constant 0 : index
    %c0_18 = arith.constant 0 : index
    %28 = vector.load %arg0[%c14, %c0_17, %c0_18] : memref<22x8x128xf32, #tpu.memory_space<vmem>>, vector<1x8x128xf32>
    %29 = vector.shape_cast %28 : vector<1x8x128xf32> to vector<8x128xf32>
    %c15 = arith.constant 15 : index
    %c0_19 = arith.constant 0 : index
    %c0_20 = arith.constant 0 : index
    %30 = vector.load %arg0[%c15, %c0_19, %c0_20] : memref<22x8x128xf32, #tpu.memory_space<vmem>>, vector<1x8x128xf32>
    %31 = vector.shape_cast %30 : vector<1x8x128xf32> to vector<8x128xf32>
    %c16 = arith.constant 16 : index
    %c0_21 = arith.constant 0 : index
    %c0_22 = arith.constant 0 : index
    %32 = vector.load %arg0[%c16, %c0_21, %c0_22] : memref<22x8x128xf32, #tpu.memory_space<vmem>>, vector<1x8x128xf32>
    %33 = vector.shape_cast %32 : vector<1x8x128xf32> to vector<8x128xf32>
    %c21 = arith.constant 21 : index
    %c0_23 = arith.constant 0 : index
    %c0_24 = arith.constant 0 : index
    %34 = vector.load %arg0[%c21, %c0_23, %c0_24] : memref<22x8x128xf32, #tpu.memory_space<vmem>>, vector<1x8x128xf32>
    %35 = vector.shape_cast %34 : vector<1x8x128xf32> to vector<8x128xf32>
    %cst_25 = arith.constant 0.000000e+00 : f32
    %36 = vector.broadcast %cst_25 : f32 to vector<8x128xf32>
    %37 = arith.cmpf ogt, %27, %36 : vector<8x128xf32>
    %c9 = arith.constant 9 : index
    %c0_26 = arith.constant 0 : index
    %c0_27 = arith.constant 0 : index
    %38 = vector.load %arg0[%c9, %c0_26, %c0_27] : memref<22x8x128xf32, #tpu.memory_space<vmem>>, vector<1x8x128xf32>
    %39 = vector.shape_cast %38 : vector<1x8x128xf32> to vector<8x128xf32>
    %40 = arith.subf %8, %39 : vector<8x128xf32>
    %cst_28 = arith.constant 0.000000e+00 : f32
    %41 = vector.broadcast %cst_28 : f32 to vector<8x128xf32>
    %42 = arith.select %37, %40, %41 : vector<8x128xi1>, vector<8x128xf32>
    %c10 = arith.constant 10 : index
    %c0_29 = arith.constant 0 : index
    %c0_30 = arith.constant 0 : index
    %43 = vector.load %arg0[%c10, %c0_29, %c0_30] : memref<22x8x128xf32, #tpu.memory_space<vmem>>, vector<1x8x128xf32>
    %44 = vector.shape_cast %43 : vector<1x8x128xf32> to vector<8x128xf32>
    %45 = arith.subf %17, %44 : vector<8x128xf32>
    %cst_31 = arith.constant 0.000000e+00 : f32
    %46 = vector.broadcast %cst_31 : f32 to vector<8x128xf32>
    %47 = arith.select %37, %45, %46 : vector<8x128xi1>, vector<8x128xf32>
    %c11 = arith.constant 11 : index
    %c0_32 = arith.constant 0 : index
    %c0_33 = arith.constant 0 : index
    %48 = vector.load %arg0[%c11, %c0_32, %c0_33] : memref<22x8x128xf32, #tpu.memory_space<vmem>>, vector<1x8x128xf32>
    %49 = vector.shape_cast %48 : vector<1x8x128xf32> to vector<8x128xf32>
    %50 = arith.subf %20, %49 : vector<8x128xf32>
    %cst_34 = arith.constant 0.000000e+00 : f32
    %51 = vector.broadcast %cst_34 : f32 to vector<8x128xf32>
    %52 = arith.select %37, %50, %51 : vector<8x128xi1>, vector<8x128xf32>
    %c12 = arith.constant 12 : index
    %c0_35 = arith.constant 0 : index
    %c0_36 = arith.constant 0 : index
    %53 = vector.load %arg0[%c12, %c0_35, %c0_36] : memref<22x8x128xf32, #tpu.memory_space<vmem>>, vector<1x8x128xf32>
    %54 = vector.shape_cast %53 : vector<1x8x128xf32> to vector<8x128xf32>
    %55 = arith.subf %23, %54 : vector<8x128xf32>
    %cst_37 = arith.constant 0.000000e+00 : f32
    %56 = vector.broadcast %cst_37 : f32 to vector<8x128xf32>
    %57 = arith.select %37, %55, %56 : vector<8x128xi1>, vector<8x128xf32>
    %58 = arith.mulf %42, %42 : vector<8x128xf32>
    %59 = arith.mulf %47, %47 : vector<8x128xf32>
    %60 = arith.addf %58, %59 : vector<8x128xf32>
    %61 = arith.mulf %52, %52 : vector<8x128xf32>
    %62 = arith.mulf %57, %57 : vector<8x128xf32>
    %63 = arith.addf %61, %62 : vector<8x128xf32>
    %64 = arith.mulf %29, %63 : vector<8x128xf32>
    %65 = arith.addf %60, %64 : vector<8x128xf32>
    %cst_38 = arith.constant dense<0.000000e+00> : vector<8xf32>
    %66 = vector.multi_reduction <add>, %65, %cst_38 [1] : vector<8x128xf32> to vector<8xf32>
    %67 = vector.shape_cast %66 : vector<8xf32> to vector<8x1xf32>
    %cst_39 = arith.constant dense<0.000000e+00> : vector<1xf32>
    %68 = vector.multi_reduction <add>, %67, %cst_39 [0] : vector<8x1xf32> to vector<1xf32>
    %69 = vector.shape_cast %68 : vector<1xf32> to vector<1x1xf32>
    %cst_40 = arith.constant 0.000000e+00 : f32
    %70 = vector.broadcast %cst_40 : f32 to vector<8x128xf32>
    %71 = arith.maximumf %25, %70 : vector<8x128xf32>
    %72 = arith.mulf %25, %31 : vector<8x128xf32>
    %73 = arith.subf %71, %72 : vector<8x128xf32>
    %74 = math.absf %25 : vector<8x128xf32>
    %cst_41 = arith.constant 0.000000e+00 : f32
    %75 = vector.broadcast %cst_41 : f32 to vector<8x128xf32>
    %76 = arith.subf %75, %74 : vector<8x128xf32>
    %77 = math.exp %76 : vector<8x128xf32>
    %cst_42 = arith.constant 1.000000e+00 : f32
    %78 = vector.broadcast %cst_42 : f32 to vector<8x128xf32>
    %79 = arith.addf %78, %77 : vector<8x128xf32>
    %80 = math.log %79 : vector<8x128xf32>
    %81 = arith.addf %73, %80 : vector<8x128xf32>
    %cst_43 = arith.constant 2.000000e+00 : f32
    %82 = vector.broadcast %cst_43 : f32 to vector<8x128xf32>
    %83 = arith.cmpf oeq, %33, %82 : vector<8x128xf32>
    %cst_44 = arith.constant 0.000000e+00 : f32
    %84 = vector.broadcast %cst_44 : f32 to vector<8x128xf32>
    %85 = arith.select %83, %81, %84 : vector<8x128xi1>, vector<8x128xf32>
    %cst_45 = arith.constant dense<0.000000e+00> : vector<8xf32>
    %86 = vector.multi_reduction <add>, %85, %cst_45 [1] : vector<8x128xf32> to vector<8xf32>
    %87 = vector.shape_cast %86 : vector<8xf32> to vector<8x1xf32>
    %cst_46 = arith.constant dense<0.000000e+00> : vector<1xf32>
    %88 = vector.multi_reduction <add>, %87, %cst_46 [0] : vector<8x1xf32> to vector<1xf32>
    %89 = vector.shape_cast %88 : vector<1xf32> to vector<1x1xf32>
    %cst_47 = arith.constant 1.000000e+00 : f32
    %90 = vector.broadcast %cst_47 : f32 to vector<8x128xf32>
    %91 = arith.cmpf oeq, %33, %90 : vector<8x128xf32>
    %cst_48 = arith.constant 0.000000e+00 : f32
    %92 = vector.broadcast %cst_48 : f32 to vector<8x128xf32>
    %93 = arith.select %91, %81, %92 : vector<8x128xi1>, vector<8x128xf32>
    %cst_49 = arith.constant dense<0.000000e+00> : vector<8xf32>
    %94 = vector.multi_reduction <add>, %93, %cst_49 [1] : vector<8x128xf32> to vector<8xf32>
    %95 = vector.shape_cast %94 : vector<8xf32> to vector<8x1xf32>
    %cst_50 = arith.constant dense<0.000000e+00> : vector<1xf32>
    %96 = vector.multi_reduction <add>, %95, %cst_50 [0] : vector<8x1xf32> to vector<1xf32>
    %97 = vector.shape_cast %96 : vector<1xf32> to vector<1x1xf32>
    %cst_51 = arith.constant 0.000000e+00 : f32
    %98 = vector.broadcast %cst_51 : f32 to vector<8x128xf32>
    %c5 = arith.constant 5 : index
    %c0_52 = arith.constant 0 : index
    %c0_53 = arith.constant 0 : index
    %99 = vector.load %arg0[%c5, %c0_52, %c0_53] : memref<22x8x128xf32, #tpu.memory_space<vmem>>, vector<1x8x128xf32>
    %100 = vector.shape_cast %99 : vector<1x8x128xf32> to vector<8x128xf32>
    %c17 = arith.constant 17 : index
    %c0_54 = arith.constant 0 : index
    %c0_55 = arith.constant 0 : index
    %101 = vector.load %arg0[%c17, %c0_54, %c0_55] : memref<22x8x128xf32, #tpu.memory_space<vmem>>, vector<1x8x128xf32>
    %102 = vector.shape_cast %101 : vector<1x8x128xf32> to vector<8x128xf32>
    %cst_56 = arith.constant 0.000000e+00 : f32
    %103 = vector.broadcast %cst_56 : f32 to vector<8x128xf32>
    %104 = arith.maximumf %100, %103 : vector<8x128xf32>
    %105 = arith.mulf %100, %102 : vector<8x128xf32>
    %106 = arith.subf %104, %105 : vector<8x128xf32>
    %107 = math.absf %100 : vector<8x128xf32>
    %cst_57 = arith.constant 0.000000e+00 : f32
    %108 = vector.broadcast %cst_57 : f32 to vector<8x128xf32>
    %109 = arith.subf %108, %107 : vector<8x128xf32>
    %110 = math.exp %109 : vector<8x128xf32>
    %cst_58 = arith.constant 1.000000e+00 : f32
    %111 = vector.broadcast %cst_58 : f32 to vector<8x128xf32>
    %112 = arith.addf %111, %110 : vector<8x128xf32>
    %113 = math.log %112 : vector<8x128xf32>
    %114 = arith.addf %106, %113 : vector<8x128xf32>
    %115 = arith.addf %98, %114 : vector<8x128xf32>
    %c6 = arith.constant 6 : index
    %c0_59 = arith.constant 0 : index
    %c0_60 = arith.constant 0 : index
    %116 = vector.load %arg0[%c6, %c0_59, %c0_60] : memref<22x8x128xf32, #tpu.memory_space<vmem>>, vector<1x8x128xf32>
    %117 = vector.shape_cast %116 : vector<1x8x128xf32> to vector<8x128xf32>
    %c18 = arith.constant 18 : index
    %c0_61 = arith.constant 0 : index
    %c0_62 = arith.constant 0 : index
    %118 = vector.load %arg0[%c18, %c0_61, %c0_62] : memref<22x8x128xf32, #tpu.memory_space<vmem>>, vector<1x8x128xf32>
    %119 = vector.shape_cast %118 : vector<1x8x128xf32> to vector<8x128xf32>
    %cst_63 = arith.constant 0.000000e+00 : f32
    %120 = vector.broadcast %cst_63 : f32 to vector<8x128xf32>
    %121 = arith.maximumf %117, %120 : vector<8x128xf32>
    %122 = arith.mulf %117, %119 : vector<8x128xf32>
    %123 = arith.subf %121, %122 : vector<8x128xf32>
    %124 = math.absf %117 : vector<8x128xf32>
    %cst_64 = arith.constant 0.000000e+00 : f32
    %125 = vector.broadcast %cst_64 : f32 to vector<8x128xf32>
    %126 = arith.subf %125, %124 : vector<8x128xf32>
    %127 = math.exp %126 : vector<8x128xf32>
    %cst_65 = arith.constant 1.000000e+00 : f32
    %128 = vector.broadcast %cst_65 : f32 to vector<8x128xf32>
    %129 = arith.addf %128, %127 : vector<8x128xf32>
    %130 = math.log %129 : vector<8x128xf32>
    %131 = arith.addf %123, %130 : vector<8x128xf32>
    %132 = arith.addf %115, %131 : vector<8x128xf32>
    %c7 = arith.constant 7 : index
    %c0_66 = arith.constant 0 : index
    %c0_67 = arith.constant 0 : index
    %133 = vector.load %arg0[%c7, %c0_66, %c0_67] : memref<22x8x128xf32, #tpu.memory_space<vmem>>, vector<1x8x128xf32>
    %134 = vector.shape_cast %133 : vector<1x8x128xf32> to vector<8x128xf32>
    %c19 = arith.constant 19 : index
    %c0_68 = arith.constant 0 : index
    %c0_69 = arith.constant 0 : index
    %135 = vector.load %arg0[%c19, %c0_68, %c0_69] : memref<22x8x128xf32, #tpu.memory_space<vmem>>, vector<1x8x128xf32>
    %136 = vector.shape_cast %135 : vector<1x8x128xf32> to vector<8x128xf32>
    %cst_70 = arith.constant 0.000000e+00 : f32
    %137 = vector.broadcast %cst_70 : f32 to vector<8x128xf32>
    %138 = arith.maximumf %134, %137 : vector<8x128xf32>
    %139 = arith.mulf %134, %136 : vector<8x128xf32>
    %140 = arith.subf %138, %139 : vector<8x128xf32>
    %141 = math.absf %134 : vector<8x128xf32>
    %cst_71 = arith.constant 0.000000e+00 : f32
    %142 = vector.broadcast %cst_71 : f32 to vector<8x128xf32>
    %143 = arith.subf %142, %141 : vector<8x128xf32>
    %144 = math.exp %143 : vector<8x128xf32>
    %cst_72 = arith.constant 1.000000e+00 : f32
    %145 = vector.broadcast %cst_72 : f32 to vector<8x128xf32>
    %146 = arith.addf %145, %144 : vector<8x128xf32>
    %147 = math.log %146 : vector<8x128xf32>
    %148 = arith.addf %140, %147 : vector<8x128xf32>
    %149 = arith.addf %132, %148 : vector<8x128xf32>
    %c8 = arith.constant 8 : index
    %c0_73 = arith.constant 0 : index
    %c0_74 = arith.constant 0 : index
    %150 = vector.load %arg0[%c8, %c0_73, %c0_74] : memref<22x8x128xf32, #tpu.memory_space<vmem>>, vector<1x8x128xf32>
    %151 = vector.shape_cast %150 : vector<1x8x128xf32> to vector<8x128xf32>
    %c20 = arith.constant 20 : index
    %c0_75 = arith.constant 0 : index
    %c0_76 = arith.constant 0 : index
    %152 = vector.load %arg0[%c20, %c0_75, %c0_76] : memref<22x8x128xf32, #tpu.memory_space<vmem>>, vector<1x8x128xf32>
    %153 = vector.shape_cast %152 : vector<1x8x128xf32> to vector<8x128xf32>
    %cst_77 = arith.constant 0.000000e+00 : f32
    %154 = vector.broadcast %cst_77 : f32 to vector<8x128xf32>
    %155 = arith.maximumf %151, %154 : vector<8x128xf32>
    %156 = arith.mulf %151, %153 : vector<8x128xf32>
    %157 = arith.subf %155, %156 : vector<8x128xf32>
    %158 = math.absf %151 : vector<8x128xf32>
    %cst_78 = arith.constant 0.000000e+00 : f32
    %159 = vector.broadcast %cst_78 : f32 to vector<8x128xf32>
    %160 = arith.subf %159, %158 : vector<8x128xf32>
    %161 = math.exp %160 : vector<8x128xf32>
    %cst_79 = arith.constant 1.000000e+00 : f32
    %162 = vector.broadcast %cst_79 : f32 to vector<8x128xf32>
    %163 = arith.addf %162, %161 : vector<8x128xf32>
    %164 = math.log %163 : vector<8x128xf32>
    %165 = arith.addf %157, %164 : vector<8x128xf32>
    %166 = arith.addf %149, %165 : vector<8x128xf32>
    %cst_80 = arith.constant 0.000000e+00 : f32
    %167 = vector.broadcast %cst_80 : f32 to vector<8x128xf32>
    %168 = arith.cmpf ogt, %35, %167 : vector<8x128xf32>
    %cst_81 = arith.constant 0.000000e+00 : f32
    %169 = vector.broadcast %cst_81 : f32 to vector<8x128xf32>
    %170 = arith.select %168, %166, %169 : vector<8x128xi1>, vector<8x128xf32>
    %cst_82 = arith.constant dense<0.000000e+00> : vector<8xf32>
    %171 = vector.multi_reduction <add>, %170, %cst_82 [1] : vector<8x128xf32> to vector<8xf32>
    %172 = vector.shape_cast %171 : vector<8xf32> to vector<8x1xf32>
    %cst_83 = arith.constant dense<0.000000e+00> : vector<1xf32>
    %173 = vector.multi_reduction <add>, %172, %cst_83 [0] : vector<8x1xf32> to vector<1xf32>
    %174 = vector.shape_cast %173 : vector<1xf32> to vector<1x1xf32>
    %175 = vector.shape_cast %69 : vector<1x1xf32> to vector<1x1xf32>
    %176 = vector.broadcast %175 : vector<1x1xf32> to vector<1x128xf32>
    %c0_84 = arith.constant 0 : index
    %c0_85 = arith.constant 0 : index
    %177 = vector.load %arg1[%c0_84, %c0_85] : memref<4x128xf32, #tpu.memory_space<vmem>>, vector<1x128xf32>
    tpu.vector_store %arg1[%c0_84, %c0_85], %176 {strides = array<i32>} : memref<4x128xf32, #tpu.memory_space<vmem>>, vector<1x128xf32>,
    %178 = vector.shape_cast %89 : vector<1x1xf32> to vector<1x1xf32>
    %179 = vector.broadcast %178 : vector<1x1xf32> to vector<1x128xf32>
    %c1_86 = arith.constant 1 : index
    %c0_87 = arith.constant 0 : index
    %180 = vector.load %arg1[%c1_86, %c0_87] : memref<4x128xf32, #tpu.memory_space<vmem>>, vector<1x128xf32>
    tpu.vector_store %arg1[%c1_86, %c0_87], %179 {strides = array<i32>} : memref<4x128xf32, #tpu.memory_space<vmem>>, vector<1x128xf32>,
    %181 = vector.shape_cast %97 : vector<1x1xf32> to vector<1x1xf32>
    %182 = vector.broadcast %181 : vector<1x1xf32> to vector<1x128xf32>
    %c2_88 = arith.constant 2 : index
    %c0_89 = arith.constant 0 : index
    %183 = vector.load %arg1[%c2_88, %c0_89] : memref<4x128xf32, #tpu.memory_space<vmem>>, vector<1x128xf32>
    tpu.vector_store %arg1[%c2_88, %c0_89], %182 {strides = array<i32>} : memref<4x128xf32, #tpu.memory_space<vmem>>, vector<1x128xf32>,
    %184 = vector.shape_cast %174 : vector<1x1xf32> to vector<1x1xf32>
    %185 = vector.broadcast %184 : vector<1x1xf32> to vector<1x128xf32>
    %c3_90 = arith.constant 3 : index
    %c0_91 = arith.constant 0 : index
    %186 = vector.load %arg1[%c3_90, %c0_91] : memref<4x128xf32, #tpu.memory_space<vmem>>, vector<1x128xf32>
    tpu.vector_store %arg1[%c3_90, %c0_91], %185 {strides = array<i32>} : memref<4x128xf32, #tpu.memory_space<vmem>>, vector<1x128xf32>,
    return
  }
}

</mosaic_0001>

<bundles_post_ra>
// kernel: _device_loss.1
= control target key start
LH: loop header
LB: loop body
LE: loop exit
PB: predicated region body
PF: predicated region fallthrough
CT: control target
= control target key end

     0   :  { %6 = vsyncpa [#allocation3], 0  ;;  %s293_s9 = smov [#allocation2]   ;;  %s294_s11 = smov 128   ;;  %s388_s0 = inlined_call_operand.hbm [shape: f32[22,8,128], index: 0, kind: input, shape index: {}]   ;;  %s389_s1 = inlined_call_operand.vmem [shape: f32[4,128], index: 1, kind: output, shape index: {}]  }
   0x1   :  { %s11_s8 = sshll.u32 %s388_s0, 4  ;;  %s13_s10 = sshll.u32 %s293_s9, 4  ;;  %s12_s8 = int_to_ptr.hbm [resolvable:$true] %s11_s8  ;;  %s14_s10 = int_to_ptr.vmem [resolvable:$true] %s13_s10 }
   0x2   :  { %s295_s12 = smov 8  }
   0x3   :  { %19 = dma.hbm_to_vmem [thread:$0]  %s12_s8, 2816, %s14_s10, [#allocation3], %s294_s11, %s294_s11, %s295_s12  }
   0x4   :  { %291 = dma.done.wait [#allocation3], 2816  }
   0x5   :  { %292 = vsyncadd [#allocation3], 4294964480  ;;  %v309_v0 = vld [vmem:[#allocation2 + $0x20] sm:$0xff]  ;;  %v45_v3 = vld [vmem:[#allocation2 + $0x8] sm:$0xff] }
   0x6   :  { %v121_v1 = vand.u32 2147483647, %v309_v0  ;;  %v24_v2 = vld [vmem:[#allocation2] sm:$0xff]  ;;  %v46_v5 = vsub.f32 0.0, %v45_v3  ;;  %v66_v6 = vld [vmem:[#allocation2 + $0x10] sm:$0xff]  ;;  %v70_v12 = vld [vmem:[#allocation2 + $0x18] sm:$0xff] }
   0x7   :  { %v25_v4 = vsub.f32 0.0, %v24_v2  ;;  %v67_v11 = vmul.f32 1.442695, %v66_v6  ;;  %v150_v13 = vld [vmem:[#allocation2 + $0x28] sm:$0xff]  ;;  %v166_v14 = vld [vmem:[#allocation2 + $0x30] sm:$0xff]  ;;  %v312_v16 = vld [vmem:[#allocation2 + $0x38] sm:$0xff] }
   0x8   :  { %v122_v7 = vsub.f32 0.0, %v121_v1  ;;  %v47_v9 = vmul.f32 1.442695, %v46_v5  ;;  %v156_v15 = vand.u32 2147483647, %v150_v13  ;;  %v314_v19 = vld [vmem:[#allocation2 + $0x40] sm:$0xff] }
   0x9   :  { %v26_v8 = vmul.f32 1.442695, %v25_v4  ;;  %v71_v17 = vmul.f32 1.442695, %v70_v12  ;;  %v172_v18 = vand.u32 2147483647, %v166_v14 }
   0xa   :  { %v123_v10 = vmul.f32 1.442695, %v122_v7  ;;  %v157_v20 = vsub.f32 0.0, %v156_v15  ;;  %v188_v22 = vand.u32 2147483647, %v312_v16  ;;  %v80_v26 = vld [vmem:[#allocation2 + $0x78] sm:$0xff] }
   0xb   :  { %235 = vpow2.f32 %v26_v8  ;;  %v173_v21 = vsub.f32 0.0, %v172_v18  ;;  %v204_v24 = vand.u32 2147483647, %v314_v19  ;;  %v152_v31 = vld [vmem:[#allocation2 + $0x88] sm:$0xff]  ;;  %v168_v35 = vld [vmem:[#allocation2 + $0x90] sm:$0xff]  ;;  %v118_v38 = vmax.f32 %v309_v0, 0.0 }
   0xc   :  { %237 = vpow2.f32 %v123_v10  ;;  %v158_v23 = vmul.f32 1.442695, %v157_v20  ;;  %v189_v28 = vsub.f32 0.0, %v188_v22  ;;  %v119_v39 = vmul.f32 %v80_v26, %v309_v0  ;;  %v95_v40 = vld [vmem:[#allocation2 + $0x58] sm:$0xff]  ;;  %v323_v41 = vld [vmem:[#allocation2 + $0x80] sm:$0xff]  ;;  %v327_v43 = vld [vmem:[#allocation2 + $0x68] sm:$0xff] }
   0xd   :  { %239 = vpow2.f32 %v47_v9  ;;  %v174_v27 = vmul.f32 1.442695, %v173_v21  ;;  %v205_v32 = vsub.f32 0.0, %v204_v24  ;;  %v153_v44 = vmax.f32 %v150_v13, 0.0  ;;  %v184_v51 = vld [vmem:[#allocation2 + $0x98] sm:$0xff]  ;;  %v99_v56 = vld [vmem:[#allocation2 + $0x60] sm:$0xff] }
   0xe   :  { %241 = vpow2.f32 %v67_v11  ;;  %v190_v36 = vmul.f32 1.442695, %v189_v28  ;;  %v154_v45 = vmul.f32 %v152_v31, %v150_v13  ;;  %v169_v46 = vmax.f32 %v166_v14, 0.0  ;;  %v87_v31 = vld [vmem:[#allocation2 + $0x48] sm:$0xff] }
   0xf   :  { %243 = vpow2.f32 %v71_v17  ;;  %v170_v47 = vmul.f32 %v168_v35, %v166_v14  ;;  %v206_v48 = vmul.f32 1.442695, %v205_v32  ;;  %v120_v53 = vsub.f32 %v118_v38, %v119_v39 }
  0x10   :  { %245 = vpow2.f32 %v158_v23  ;;  %vm139_vm0 = vcmp.eq.f32.partialorder %v323_v41, 1.0  ;;  %vm85_vm1 = vcmp.gt.f32.partialorder %v327_v43, 0.0  ;;  %v155_v57 = vsub.f32 %v153_v44, %v154_v45 }
  0x11   :  { %v236_v25 = vpop.eup %235  ;;  %247 = vpow2.f32 %v174_v27  ;;  %v185_v59 = vmax.f32 %v312_v16, 0.0  ;;  %v171_v61 = vsub.f32 %v169_v46, %v170_v47  ;;  %v186_v63 = vmul.f32 %v184_v51, %v312_v16  ;;  %v200_v16 = vld [vmem:[#allocation2 + $0xa0] sm:$0xff]  ;;  %v91_v46 = vld [vmem:[#allocation2 + $0x50] sm:$0xff] }
  0x12   :  { %v238_v29 = vpop.eup %237  ;;  %v318_v30 = vadd.f32 1.0, %v236_v25  ;;  %v201_v0 = vmax.f32 %v314_v19, 0.0  ;;  %v202_v27 = vmul.f32 %v200_v16, %v314_v19  ;;  %vm129_vm11 = vcmp.eq.f32.partialorder %v323_v41, 2.0 }
  0x13   :  { %v240_v33 = vpop.eup %239  ;;  %v125_v34 = vadd.f32 1.0, %v238_v29 }
  0x14   :  { %v242_v37 = vpop.eup %241  ;;  %249 = vrcp.f32 %v318_v30  ;;  %v325_v42 = vadd.f32 1.0, %v240_v33  ;;  %v40_v55 = vand.u32 2147483648, %v318_v30  ;;  %vm34_vm2 = vweird.f32 %v318_v30 }
  0x15   :  { %251 = vlog2.f32 %v125_v34  ;;  %v244_v49 = vpop.eup %243  ;;  %v96_v50 = vsub.f32 %v242_v37, %v95_v40  ;;  %v38_v6 = vand.u32 2147483647, %v318_v30  ;;  %v187_v33 = vsub.f32 %v185_v59, %v186_v63 }
  0x16   :  { %253 = vpow2.f32 %v190_v36  ;;  %v246_v52 = vpop.eup %245  ;;  %v100_v7 = vsub.f32 %v244_v49, %v99_v56  ;;  %v41_v10 = vor.u32 1.1754944e-38, %v40_v55  ;;  %vm55_vm4 = vweird.f32 %v325_v42  ;;  %v78_v55 = vld [vmem:[#allocation2 + $0x70] sm:$0xff] }
  0x17   :  { %255 = vrcp.f32 %v325_v42  ;;  %v248_v54 = vpop.eup %247  ;;  %v160_v58 = vadd.f32 1.0, %v246_v52  ;;  %v97_v3 = vsel %vm85_vm1, %v96_v50, 0.0  ;;  %v59_v15 = vand.u32 2147483647, %v325_v42 }
  0x18   :  { %257 = vpow2.f32 %v206_v48  ;;  %v176_v62 = vadd.f32 1.0, %v248_v54  ;;  %v61_v18 = vand.u32 2147483648, %v325_v42  ;;  %v101_v24 = vsel %vm85_vm1, %v100_v7, 0.0 }
  0x19   :  { %259 = vlog2.f32 %v160_v58  ;;  %vm39_vm7 = vcmp.eq.f32.partialorder %v38_v6, 8.507059e+37  ;;  %v106_v37 = vmul.f32 %v101_v24, %v101_v24  ;;  %vm60_vm9 = vcmp.eq.f32.partialorder %v59_v15, 8.507059e+37  ;;  %v84_v58 = vld [vmem:[#allocation2 + $0xa8] sm:$0xff] }
  0x1a   :  { %v250_v60 = vpop.eup %249  ;;  %261 = vlog2.f32 %v176_v62  ;;  %v62_v36 = vor.u32 1.1754944e-38, %v61_v18  ;;  %vm213_vm10 = vcmp.gt.f32.partialorder %v84_v58, 0.0 }
  0x1b   :  { %v252_v1 = vpop.eup %251  ;;  %v30_v2 = vmul.f32 %v250_v60, %v318_v30  ;;  %vm35_vm3 = vweird.f32 %v250_v60  ;;  %v105_v30 = vmul.f32 %v97_v3, %v97_v3 }
  0x1c   :  { %v254_v4 = vpop.eup %253  ;;  %v127_v5 = vmul.f32 0.6931472, %v252_v1  ;;  %vm352_vm5 = vmor %vm34_vm2, %vm35_vm3 }
  0x1d   :  { %v256_v8 = vpop.eup %255  ;;  %v31_v9 = vsub.f32 1.0, %v30_v2  ;;  %v192_v11 = vadd.f32 1.0, %v254_v4 }
  0x1e   :  { %v258_v12 = vpop.eup %257  ;;  %v341_v13 = vadd.f32 %v127_v5, %v120_v53  ;;  %v51_v14 = vmul.f32 %v256_v8, %v325_v42  ;;  %vm56_vm6 = vweird.f32 %v256_v8  ;;  %v203_v42 = vsub.f32 %v201_v0, %v202_v27 }
  0x1f   :  { %v32_v17 = vmul.f32 %v250_v60, %v31_v9  ;;  %263 = vlog2.f32 %v192_v11  ;;  %v208_v20 = vadd.f32 1.0, %v258_v12  ;;  %v260_v25 = vpop.eup %259  ;;  %vm364_vm8 = vmor %vm55_vm4, %vm56_vm6  ;;  %v107_v53 = vadd.f32 %v106_v37, %v105_v30 }
  0x20   :  { %v140_v21 = vsel %vm139_vm0, %v341_v13, 0.0  ;;  %v52_v23 = vsub.f32 1.0, %v51_v14  ;;  %v262_v28 = vpop.eup %261  ;;  %v162_v32 = vmul.f32 0.6931472, %v260_v25  ;;  %v130_v6 = vsel %vm129_vm11, %v341_v13, 0.0 }
  0x21   :  { %141 = vadd.xlane.f32.xlu1 %v140_v21  ;;  %v33_v26 = vadd.f32 %v250_v60, %v32_v17  ;;  %265 = vlog2.f32 %v208_v20  ;;  %v178_v19 = vmul.f32 0.6931472, %v262_v28  ;;  %v108_v0 = vmul.f32 %v107_v53, %v78_v55 }
  0x22   :  { %v53_v29 = vmul.f32 %v256_v8, %v52_v23  ;;  %v163_v40 = vadd.f32 %v162_v32, %v155_v57 }
  0x23   :  { %v37_v34 = vsel %vm352_vm5, %v250_v60, %v33_v26  ;;  %v179_v47 = vadd.f32 %v178_v19, %v171_v61 }
  0x24   :  { %v42_v38 = vsel %vm39_vm7, %v41_v10, %v37_v34  ;;  %v54_v39 = vadd.f32 %v256_v8, %v53_v29 }
  0x25   :  { %v264_v44 = vpop.eup %263  ;;  %v88_v45 = vsub.f32 %v42_v38, %v87_v31  ;;  %v180_v54 = vadd.f32 %v179_v47, %v163_v40 }
  0x26   :  { %v58_v48 = vsel %vm364_vm8, %v256_v8, %v54_v39  ;;  %v194_v49 = vmul.f32 0.6931472, %v264_v44 }
  0x27   :  { %v266_v50 = vpop.eup %265  ;;  %v63_v51 = vsel %vm60_vm9, %v62_v36, %v58_v48  ;;  %v89_v52 = vsel %vm85_vm1, %v88_v45, 0.0 }
  0x28   :  { %v92_v56 = vsub.f32 %v63_v51, %v91_v46  ;;  %v195_v57 = vadd.f32 %v194_v49, %v187_v33  ;;  %v210_v59 = vmul.f32 0.6931472, %v266_v50  ;;  %v102_v60 = vmul.f32 %v89_v52, %v89_v52 }
  0x2a   :  { %v93_v61 = vsel %vm85_vm1, %v92_v56, 0.0  ;;  %v196_v62 = vadd.f32 %v195_v57, %v180_v54  ;;  %v211_v63 = vadd.f32 %v210_v59, %v203_v42 }
  0x2b   :  { %v103_v1 = vmul.f32 %v93_v61, %v93_v61 }
  0x2c   :  { %v212_v2 = vadd.f32 %v211_v63, %v196_v62 }
  0x2d   :  { %v104_v3 = vadd.f32 %v103_v1, %v102_v60 }
  0x2e   :  { %v214_v4 = vsel %vm213_vm10, %v212_v2, 0.0 }
  0x2f   :  { %v109_v5 = vadd.f32 %v108_v0, %v104_v3  ;;  %215 = vadd.xlane.f32.xlu1 %v214_v4 }
  0x31   :  { %110 = vadd.xlane.f32.xlu0 %v109_v5 }
  0x39   :  { %131 = vadd.xlane.f32.xlu0 %v130_v6 }
  0x94   :  { %v142_v7 = vpop.xlane.xlu1 %141 }
  0x95   :  { %v143_v8 = vrot.slane %v142_v7, 4 }
  0x97   :  { %v144_v43 = vadd.f32 %v143_v8, %v142_v7 }
  0x99   :  { %v145_v9 = vrot.slane %v144_v43, 2 }
  0x9b   :  { %v146_v10 = vadd.f32 %v145_v9, %v144_v43 }
  0x9d   :  { %v147_v11 = vrot.slane %v146_v10, 1 }
  0x9f   :  { %v148_v12 = vadd.f32 %v147_v11, %v146_v10 }
  0xa1   :  { %225 = vst [vmem:[%s389_s1 + $0x2] sm:$0x1] %v148_v12 }
  0xa2   :  { %v216_v14 = vpop.xlane.xlu1 %215 }
  0xa3   :  { %v217_v15 = vrot.slane %v216_v14, 4 }
  0xa4   :  { %v111_v16 = vpop.xlane.xlu0 %110 }
  0xa5   :  { %v112_v17 = vrot.slane %v111_v16, 4  ;;  %v218_v18 = vadd.f32 %v217_v15, %v216_v14 }
  0xa7   :  { %v113_v41 = vadd.f32 %v112_v17, %v111_v16  ;;  %v219_v20 = vrot.slane %v218_v18, 2 }
  0xa9   :  { %v114_v13 = vrot.slane %v113_v41, 2  ;;  %v220_v21 = vadd.f32 %v219_v20, %v218_v18 }
  0xab   :  { %v115_v22 = vadd.f32 %v114_v13, %v113_v41  ;;  %v221_v23 = vrot.slane %v220_v21, 1 }
  0xac   :  { %v132_v24 = vpop.xlane.xlu0 %131 }
  0xad   :  { %v116_v25 = vrot.slane %v115_v22, 1  ;;  %v222_v26 = vadd.f32 %v221_v23, %v220_v21  ;;  %v133_v27 = vrot.slane %v132_v24, 4 }
  0xaf   :  { %v117_v28 = vadd.f32 %v116_v25, %v115_v22  ;;  %226 = vst [vmem:[%s389_s1 + $0x3] sm:$0x1] %v222_v26  ;;  %v134_v29 = vadd.f32 %v133_v27, %v132_v24 }
  0xb1   :  { %223 = vst [vmem:[%s389_s1] sm:$0x1] %v117_v28  ;;  %v135_v31 = vrot.slane %v134_v29, 2 }
  0xb3   :  { %v136_v30 = vadd.f32 %v135_v31, %v134_v29 }
  0xb5   :  { %v137_v32 = vrot.slane %v136_v30, 1 }
  0xb7   :  { %v138_v33 = vadd.f32 %v137_v32, %v136_v30 }
  0xb9   :  { %224 = vst [vmem:[%s389_s1 + $0x1] sm:$0x1] %v138_v33 }
  0xba   :  { %231 = vsyncpa [#allocation3], 1 }

</bundles_post_ra>
